<compile_context>
chip_gen: v6e
topology: v6e:2x2x1
jax: 0.10.0
libtpu: 0.0.40
codegen_flags: <defaults>
</compile_context>

<pallas_src>
import functools

import jax
import jax.numpy as jnp
from jax.experimental import pallas as pl
from jax.experimental.pallas import tpu as pltpu

LANE = 128            # lane-dense last dim -> full 128-lane vregs, unmasked stores
MAX_TILE_ROWS = 1024  # 1024*128*4B = 512 KiB per stream per buffer;
                      # pass-1 footprint ~5 MiB double-buffered -> fits every chip


def _effect_stats_kernel(cause_ref, a_ref, b_ref, noise_ref,
                         effect_ref, part_ref, *, rows, tile_rows):
    """Effect tile + per-tile partial [sum, sumsq] (lane-wise, reduced later)."""
    cause = cause_ref[...]
    # Horner form: 4 VALU ops/element instead of 5.
    effect = (a_ref[...] * cause + b_ref[...]) * cause + noise_ref[...]
    effect_ref[...] = effect

    if rows % tile_rows:  # static: only emitted when a ragged tail tile exists
        row = (jax.lax.broadcasted_iota(jnp.int32, (tile_rows, LANE), 0)
               + pl.program_id(0) * tile_rows)
        effect = jnp.where(row < rows, effect, 0.0)

    part_ref[0, 0] = jnp.sum(effect, axis=0, keepdims=True)            # (1, LANE)
    part_ref[0, 1] = jnp.sum(effect * effect, axis=0, keepdims=True)   # (1, LANE)


def _normalize_kernel(stats_ref, effect_ref, out_ref, *, n):
    """(effect - mean) * rsqrt(var); scalar finalize fused in (per-tile scalars)."""
    total = stats_ref[0]
    sumsq = stats_ref[1]
    mean = total * jnp.float32(1.0 / n)
    # Unbiased (ddof=1) variance, matching torch.std().  n == 1 gives 0/0 = nan,
    # exactly like torch.std(ddof=1) on a single element.
    var = (sumsq - total * mean) / jnp.float32(n - 1)
    inv_std = jax.lax.rsqrt(var)
    out_ref[...] = (effect_ref[...] - mean) * inv_std


@jax.jit
def hadamard_fun(cause, a, b, noise):
    nsamples, ndims = cause.shape
    n = nsamples * ndims

    rows = pl.cdiv(n, LANE)
    pad = rows * LANE - n          # < 128; only nonzero when n % 128 != 0

    def prep(x):
        flat = x.reshape(-1).astype(jnp.float32)
        if pad:                     # rare path: costs one copy per input
            flat = jnp.pad(flat, (0, pad))
        return flat.reshape(rows, LANE)   # free reshape when pad == 0

    cause2, a2, b2, noise2 = prep(cause), prep(a), prep(b), prep(noise)

    # Block never exceeds the array; ragged tail tiles are masked in-kernel.
    tile_rows = rows if rows <= MAX_TILE_ROWS else MAX_TILE_ROWS
    num_tiles = pl.cdiv(rows, tile_rows)

    tile_spec = pl.BlockSpec((tile_rows, LANE), lambda i: (i, 0))

    # ---- Pass 1: effect + per-tile partial stats.  Every grid step owns its
    # own output blocks, so the axis is "parallel" (v7x can split across TCs).
    effect, partials = pl.pallas_call(
        functools.partial(_effect_stats_kernel, rows=rows, tile_rows=tile_rows),
        out_shape=(
            jax.ShapeDtypeStruct((rows, LANE), jnp.float32),
            jax.ShapeDtypeStruct((num_tiles, 2, 1, LANE), jnp.float32),
        ),
        grid=(num_tiles,),
        in_specs=[tile_spec, tile_spec, tile_spec, tile_spec],
        out_specs=(
            tile_spec,
            pl.BlockSpec((1, 2, 1, LANE), lambda i: (i, 0, 0, 0)),
        ),
        compiler_params=pltpu.CompilerParams(
            dimension_semantics=("parallel",)),
    )(cause2, a2, b2, noise2)

    # Tiny cross-tile reduction (num_tiles * 256 floats) -> [sum, sumsq].
    stats = jnp.sum(partials, axis=(0, 2, 3))

    # ---- Pass 2: normalize in place (effect buffer aliased into the output).
    # Only 1 HBM read stream + 1 write stream.
    out = pl.pallas_call(
        functools.partial(_normalize_kernel, n=n),
        out_shape=jax.ShapeDtypeStruct((rows, LANE), jnp.float32),
        grid=(num_tiles,),
        in_specs=[
            pl.BlockSpec(memory_space=pltpu.MemorySpace.SMEM),
            tile_spec,
        ],
        out_specs=tile_spec,
        input_output_aliases={1: 0},
        compiler_params=pltpu.CompilerParams(
            dimension_semantics=("parallel",)),
    )(stats, effect)

    out = out.reshape(-1)
    if pad:
        out = out[:n]
    return out.reshape(nsamples, ndims)


if __name__ == "__main__":
    # HadamardFun(indim, outdim) requires indim == outdim; it acts elementwise
    # on a [nsamples, ndims] batch.
    # TODO(synk): torch.rand/torch.randn/random.sample RNG cannot be bit-matched
    # in JAX; A, B and the noise are supplied as deterministic precomputed inputs.
    def make_inputs(key, nsamples, ndims):
        k_cause, k_a, k_b, k_scale, k_randn, k_sign = jax.random.split(key, 6)
        cause = jax.random.normal(k_cause, (nsamples, ndims), dtype=jnp.float32)
        a = jax.random.uniform(k_a, (nsamples, ndims), dtype=jnp.float32)
        b = jax.random.uniform(k_b, (nsamples, ndims), dtype=jnp.float32)
        # normal_noise: rand(1) * randn(n, d) + (+1 or -1 chosen at random)
        scl = jax.random.uniform(k_scale, (1,), dtype=jnp.float32)
        randn = jax.random.normal(k_randn, (nsamples, ndims), dtype=jnp.float32)
        sign = jnp.where(jax.random.bernoulli(k_sign), 1.0, -1.0).astype(jnp.float32)
        noise = scl * randn + sign
        return cause, a, b, noise

    def reference(cause, a, b, noise):
        effect = a * cause * cause + b * cause + noise
        return (effect - effect.mean()) / effect.std(ddof=1)

    key = jax.random.PRNGKey(0)
    k1, k2, k3 = jax.random.split(key, 3)

    # Small shape from the module spec (single tile, block == full array).
    cause, a, b, noise = make_inputs(k1, 8, 32)
    out = hadamard_fun(cause, a, b, noise)
    jax.block_until_ready(out)
    assert out.shape == (8, 32)
    assert jnp.allclose(out, reference(cause, a, b, noise), atol=1e-5, rtol=1e-5)

    # Larger shape: 2 tiles with a ragged (masked) tail tile, no input copies.
    cause, a, b, noise = make_inputs(k2, 384, 512)
    out = hadamard_fun(cause, a, b, noise)
    jax.block_until_ready(out)
    assert out.shape == (384, 512)
    assert jnp.allclose(out, reference(cause, a, b, noise), atol=1e-4, rtol=1e-4)

    # Odd shape exercising the n % 128 != 0 (zero-pad) path.
    cause, a, b, noise = make_inputs(k3, 7, 33)
    out = hadamard_fun(cause, a, b, noise)
    jax.block_until_ready(out)
    assert out.shape == (7, 33)
    assert jnp.allclose(out, reference(cause, a, b, noise), atol=1e-5, rtol=1e-5)

    print("KERNEL_OK")
</pallas_src>

<mosaic_0001>
module attributes {stable_mosaic.version = 11 : i64} {
  func.func @_effect_stats_kernel(%arg0: i32, %arg1: memref<2x128xf32, #tpu.memory_space<vmem>>, %arg2: memref<2x128xf32, #tpu.memory_space<vmem>>, %arg3: memref<2x128xf32, #tpu.memory_space<vmem>>, %arg4: memref<2x128xf32, #tpu.memory_space<vmem>>, %arg5: memref<2x128xf32, #tpu.memory_space<vmem>>, %arg6: memref<1x2x1x128xf32, #tpu.memory_space<vmem>>) attributes {dimension_semantics = [#tpu.dimension_semantics<parallel>], iteration_bounds = array<i64: 1>, scalar_prefetch = 0 : i64, scratch_operands = 0 : i64, tpu.core_type = #tpu.core_type<tc>, window_params = [{transform_indices = @transform_0, window_bounds = array<i64: 2, 128>}, {transform_indices = @transform_1, window_bounds = array<i64: 2, 128>}, {transform_indices = @transform_2, window_bounds = array<i64: 2, 128>}, {transform_indices = @transform_3, window_bounds = array<i64: 2, 128>}, {transform_indices = @transform_4, window_bounds = array<i64: 2, 128>}, {transform_indices = @transform_5, window_bounds = array<i64: 1, 2, 1, 128>}]} {
    %c0 = arith.constant 0 : index
    %c0_0 = arith.constant 0 : index
    %0 = vector.load %arg1[%c0, %c0_0] : memref<2x128xf32, #tpu.memory_space<vmem>>, vector<2x128xf32>
    %c0_1 = arith.constant 0 : index
    %c0_2 = arith.constant 0 : index
    %1 = vector.load %arg2[%c0_1, %c0_2] : memref<2x128xf32, #tpu.memory_space<vmem>>, vector<2x128xf32>
    %2 = arith.mulf %1, %0 : vector<2x128xf32>
    %c0_3 = arith.constant 0 : index
    %c0_4 = arith.constant 0 : index
    %3 = vector.load %arg3[%c0_3, %c0_4] : memref<2x128xf32, #tpu.memory_space<vmem>>, vector<2x128xf32>
    %4 = arith.addf %2, %3 : vector<2x128xf32>
    %5 = arith.mulf %4, %0 : vector<2x128xf32>
    %c0_5 = arith.constant 0 : index
    %c0_6 = arith.constant 0 : index
    %6 = vector.load %arg4[%c0_5, %c0_6] : memref<2x128xf32, #tpu.memory_space<vmem>>, vector<2x128xf32>
    %7 = arith.addf %5, %6 : vector<2x128xf32>
    %c0_7 = arith.constant 0 : index
    %c0_8 = arith.constant 0 : index
    %8 = vector.load %arg5[%c0_7, %c0_8] : memref<2x128xf32, #tpu.memory_space<vmem>>, vector<2x128xf32>
    tpu.vector_store %arg5[%c0_7, %c0_8], %7 {strides = array<i32>} : memref<2x128xf32, #tpu.memory_space<vmem>>, vector<2x128xf32>,
    %cst = arith.constant dense<0.000000e+00> : vector<128xf32>
    %9 = vector.multi_reduction <add>, %7, %cst [0] : vector<2x128xf32> to vector<128xf32>
    %10 = vector.shape_cast %9 : vector<128xf32> to vector<1x128xf32>
    %c0_9 = arith.constant 0 : index
    %c0_10 = arith.constant 0 : index
    %c0_11 = arith.constant 0 : index
    %c0_12 = arith.constant 0 : index
    %11 = vector.load %arg6[%c0_9, %c0_10, %c0_11, %c0_12] : memref<1x2x1x128xf32, #tpu.memory_space<vmem>>, vector<1x1x1x128xf32>
    %12 = vector.shape_cast %11 : vector<1x1x1x128xf32> to vector<1x128xf32>
    %13 = vector.shape_cast %10 : vector<1x128xf32> to vector<1x1x1x128xf32>
    tpu.vector_store %arg6[%c0_9, %c0_10, %c0_11, %c0_12], %13 {strides = array<i32>} : memref<1x2x1x128xf32, #tpu.memory_space<vmem>>, vector<1x1x1x128xf32>,
    %14 = arith.mulf %7, %7 : vector<2x128xf32>
    %cst_13 = arith.constant dense<0.000000e+00> : vector<128xf32>
    %15 = vector.multi_reduction <add>, %14, %cst_13 [0] : vector<2x128xf32> to vector<128xf32>
    %16 = vector.shape_cast %15 : vector<128xf32> to vector<1x128xf32>
    %c0_14 = arith.constant 0 : index
    %c1 = arith.constant 1 : index
    %c0_15 = arith.constant 0 : index
    %c0_16 = arith.constant 0 : index
    %17 = vector.load %arg6[%c0_14, %c1, %c0_15, %c0_16] : memref<1x2x1x128xf32, #tpu.memory_space<vmem>>, vector<1x1x1x128xf32>
    %18 = vector.shape_cast %17 : vector<1x1x1x128xf32> to vector<1x128xf32>
    %19 = vector.shape_cast %16 : vector<1x128xf32> to vector<1x1x1x128xf32>
    tpu.vector_store %arg6[%c0_14, %c1, %c0_15, %c0_16], %19 {strides = array<i32>} : memref<1x2x1x128xf32, #tpu.memory_space<vmem>>, vector<1x1x1x128xf32>,
    return
  }
  func.func @transform_0(%arg0: i32) -> (i32, i32) {
    %c0_i32 = arith.constant 0 : i32
    %c0_i32_0 = arith.constant 0 : i32
    return %arg0, %c0_i32 : i32, i32
  }
  func.func @transform_1(%arg0: i32) -> (i32, i32) {
    %c0_i32 = arith.constant 0 : i32
    %c0_i32_0 = arith.constant 0 : i32
    return %arg0, %c0_i32 : i32, i32
  }
  func.func @transform_2(%arg0: i32) -> (i32, i32) {
    %c0_i32 = arith.constant 0 : i32
    %c0_i32_0 = arith.constant 0 : i32
    return %arg0, %c0_i32 : i32, i32
  }
  func.func @transform_3(%arg0: i32) -> (i32, i32) {
    %c0_i32 = arith.constant 0 : i32
    %c0_i32_0 = arith.constant 0 : i32
    return %arg0, %c0_i32 : i32, i32
  }
  func.func @transform_4(%arg0: i32) -> (i32, i32) {
    %c0_i32 = arith.constant 0 : i32
    %c0_i32_0 = arith.constant 0 : i32
    return %arg0, %c0_i32 : i32, i32
  }
  func.func @transform_5(%arg0: i32) -> (i32, i32, i32, i32) {
    %c0_i32 = arith.constant 0 : i32
    %c0_i32_0 = arith.constant 0 : i32
    %c0_i32_1 = arith.constant 0 : i32
    %c0_i32_2 = arith.constant 0 : i32
    return %arg0, %c0_i32, %c0_i32_0, %c0_i32_1 : i32, i32, i32, i32
  }
}

module attributes {stable_mosaic.version = 11 : i64} {
  func.func @_normalize_kernel(%arg0: i32, %arg1: memref<2xf32, #tpu.memory_space<smem>>, %arg2: memref<2x128xf32, #tpu.memory_space<vmem>>, %arg3: memref<2x128xf32, #tpu.memory_space<vmem>>) attributes {dimension_semantics = [#tpu.dimension_semantics<parallel>], iteration_bounds = array<i64: 1>, scalar_prefetch = 0 : i64, scratch_operands = 0 : i64, tpu.core_type = #tpu.core_type<tc>, window_params = [{transform_indices = @transform_0, window_bounds = array<i64: 2>}, {transform_indices = @transform_1, window_bounds = array<i64: 2, 128>}, {transform_indices = @transform_2, window_bounds = array<i64: 2, 128>}]} {
    %c0 = arith.constant 0 : index
    %0 = memref.load %arg1[%c0] : memref<2xf32, #tpu.memory_space<smem>>
    %c1 = arith.constant 1 : index
    %1 = memref.load %arg1[%c1] : memref<2xf32, #tpu.memory_space<smem>>
    %cst = arith.constant 3.906250e-03 : f32
    %2 = arith.mulf %0, %cst : f32
    %3 = arith.mulf %0, %2 : f32
    %4 = arith.subf %1, %3 : f32
    %cst_0 = arith.constant 2.550000e+02 : f32
    %5 = arith.divf %4, %cst_0 : f32
    %6 = math.rsqrt %5 : f32
    %c0_1 = arith.constant 0 : index
    %c0_2 = arith.constant 0 : index
    %7 = vector.load %arg2[%c0_1, %c0_2] : memref<2x128xf32, #tpu.memory_space<vmem>>, vector<2x128xf32>
    %8 = vector.broadcast %2 : f32 to vector<2x128xf32>
    %9 = arith.subf %7, %8 : vector<2x128xf32>
    %10 = vector.broadcast %6 : f32 to vector<2x128xf32>
    %11 = arith.mulf %9, %10 : vector<2x128xf32>
    %c0_3 = arith.constant 0 : index
    %c0_4 = arith.constant 0 : index
    %12 = vector.load %arg3[%c0_3, %c0_4] : memref<2x128xf32, #tpu.memory_space<vmem>>, vector<2x128xf32>
    tpu.vector_store %arg3[%c0_3, %c0_4], %11 {strides = array<i32>} : memref<2x128xf32, #tpu.memory_space<vmem>>, vector<2x128xf32>,
    return
  }
  func.func @transform_0(%arg0: i32) -> i32 {
    %c0_i32 = arith.constant 0 : i32
    %c0_i32_0 = arith.constant 0 : i32
    return %c0_i32 : i32
  }
  func.func @transform_1(%arg0: i32) -> (i32, i32) {
    %c0_i32 = arith.constant 0 : i32
    %c0_i32_0 = arith.constant 0 : i32
    return %arg0, %c0_i32 : i32, i32
  }
  func.func @transform_2(%arg0: i32) -> (i32, i32) {
    %c0_i32 = arith.constant 0 : i32
    %c0_i32_0 = arith.constant 0 : i32
    return %arg0, %c0_i32 : i32, i32
  }
}

</mosaic_0001>

<bundles_post_ra>
// kernel: hadamard_fun.3
= control target key start
LH: loop header
LB: loop body
LE: loop exit
PB: predicated region body
PF: predicated region fallthrough
CT: control target
= control target key end

     0   :  { %7 = vsyncpa [#allocation3], 0  ;;  %s91_s0 = inlined_call_operand.vmem [shape: f32[2], index: 0, kind: input, shape index: {}]   ;;  %s92_s1 = inlined_call_operand.vmem [shape: f32[2,128], index: 1, kind: input, shape index: {}, may-alias: {1,2}]   ;;  %s93_s2 = inlined_call_operand.vmem [shape: f32[2,128], index: 2, kind: output, shape index: {}, may-alias: {1,2}]  }
   0x1   :  { %s14_s11 = sshll.u32 %s91_s0, 4  ;;  %s15_s11 = int_to_ptr.vmem [resolvable:$true] %s14_s11 }
   0x2   :  { %s52_s12 = scalar_lea.vmem %s15_s11, 16  ;;  %p57_p1 = scmp.lt.s32.totalorder %s15_s11, %s15_s11 }
   0x3   :  { %p53_p0 = scmp.ne.s32.totalorder %s15_s11, %s52_s12  ;;  %p58_p2 = scmp.lt.s32.totalorder %s52_s12, %s52_s12 }
   0x5   :  { %p59_p3 = por %p58_p2, %p57_p1 }
   0x7   :  { %p60_p4 = pnand %p59_p3, %p53_p0 }
   0x9   :  { %63 = shalt.err (!%p60_p4)
}
   0xa   :  { %s66_s13 = smov [#allocation2]  }
   0xb   :  { %17 = dma.vmem_to_smem %s15_s11, 16, %s66_s13, [#allocation3]  }
   0xc   :  { %64 = dma.done.wait [#allocation3], 16  }
   0xd   :  { %65 = vsyncadd [#allocation3], 4294967280 }
   0xe   :  { %23 = sfence }
   0xf   :  { %s24_s14 = sld [smem:[#allocation2]]  ;;  %v35_v2 = vld [vmem:[%s92_s1] sm:$0x3] }
  0x10   :  { %s46_s15 = sld [smem:[#allocation2 + $0x1]] }
  0x15   :  { %s26_s16 = smul.f32 0.00390625, %s24_s14 }
  0x17   :  { %s27_s17 = smul.f32 %s26_s16, %s24_s14  ;;  %v36_v3 = vstv %s26_s16 }
  0x18   :  { %v37_v4 = vsub.f32 %v35_v2, %v36_v3 }
  0x19   :  { %s28_s18 = ssub.f32 %s46_s15, %s27_s17 }
  0x1b   :  { %s31_s19 = smul.f32 0.003921569, %s28_s18 }
  0x1d   :  { %v32_v0 = vstv %s31_s19 }
  0x1e   :  { %50 = vrsqrt.f32 %v32_v0 }
  0x2b   :  { %v51_v1 = vpop.eup %50 }
  0x2c   :  { %47 = vpush %v51_v1 }
  0x5d   :  { %s48_s21 = spop %47 }
  0x5e   :  { %v38_v5 = vstv %s48_s21 }
  0x5f   :  { %v39_v6 = vmul.f32 %v38_v5, %v37_v4 }
  0x61   :  { %40 = vst [vmem:[%s93_s2] sm:$0x3] %v39_v6 }
  0x62   :  { %45 = vsyncpa [#allocation3], 1 }

// kernel: hadamard_fun.2
= control target key start
LH: loop header
LB: loop body
LE: loop exit
PB: predicated region body
PF: predicated region fallthrough
CT: control target
= control target key end

     0   :  { %vm28_vm0 = vcmask 1041408   ;;  %s107_s0 = inlined_call_operand.vmem [shape: f32[2,128], index: 0, kind: input, shape index: {}]   ;;  %s108_s1 = inlined_call_operand.vmem [shape: f32[2,128], index: 1, kind: input, shape index: {}]   ;;  %s109_s2 = inlined_call_operand.vmem [shape: f32[2,128], index: 2, kind: input, shape index: {}]   ;;  %s110_s3 = inlined_call_operand.vmem [shape: f32[2,128], index: 3, kind: input, shape index: {}]   ;;  %s111_s4 = inlined_call_operand.vmem [shape: f32[2,128], index: 4, kind: output, shape index: {0}]   ;;  %s112_s5 = inlined_call_operand.vmem [shape: f32[1,2,1,128], index: 5, kind: output, shape index: {1}]  }
   0x1   :  { %v19_v0 = vld [vmem:[%s107_s0] sm:$0x3] }
   0x2   :  { %v20_v1 = vld [vmem:[%s108_s1] sm:$0x3] }
   0x3   :  { %v22_v2 = vld [vmem:[%s109_s2] sm:$0x3]  ;;  %v21_v3 = vmul.f32 %v20_v1, %v19_v0 }
   0x4   :  { %v25_v5 = vld [vmem:[%s110_s3] sm:$0x3] }
   0x5   :  { %v23_v4 = vadd.f32 %v22_v2, %v21_v3 }
   0x7   :  { %v24_v6 = vmul.f32 %v23_v4, %v19_v0 }
   0x9   :  { %v26_v7 = vadd.f32 %v25_v5, %v24_v6 }
   0xb   :  { %27 = vst [vmem:[%s111_s4] sm:$0x3] %v26_v7  ;;  %v29_v8 = vsel %vm28_vm0, %v26_v7, 0.0  ;;  %v37_v9 = vmul.f32 %v26_v7, %v26_v7 }
   0xc   :  { %v30_v10 = vrot.slane %v29_v8, 4 }
   0xd   :  { %v38_v11 = vsel %vm28_vm0, %v37_v9, 0.0 }
   0xe   :  { %v31_v12 = vadd.f32 %v30_v10, %v29_v8  ;;  %v39_v13 = vrot.slane %v38_v11, 4 }
  0x10   :  { %v32_v14 = vrot.slane %v31_v12, 2  ;;  %v40_v15 = vadd.f32 %v39_v13, %v38_v11 }
  0x12   :  { %v33_v16 = vadd.f32 %v32_v14, %v31_v12  ;;  %v41_v17 = vrot.slane %v40_v15, 2 }
  0x14   :  { %v34_v18 = vrot.slane %v33_v16, 1  ;;  %v42_v19 = vadd.f32 %v41_v17, %v40_v15 }
  0x16   :  { %v35_v20 = vadd.f32 %v34_v18, %v33_v16  ;;  %v43_v21 = vrot.slane %v42_v19, 1 }
  0x18   :  { %36 = vst [vmem:[%s112_s5] sm:$0x1] %v35_v20  ;;  %v44_v22 = vadd.f32 %v43_v21, %v42_v19 }
  0x1a   :  { %55 = vst [vmem:[%s112_s5 + $0x1] sm:$0x1] %v44_v22 }

</bundles_post_ra>
